<compile_context>
chip_gen: v7x
topology: tpu7x:2x2x1
jax: 0.10.0
libtpu: 0.0.40
codegen_flags: <defaults>
</compile_context>

<pallas_src>
from functools import partial

import jax
import jax.numpy as jnp
from jax.experimental import pallas as pl
from jax.experimental.pallas import tpu as pltpu


def _graphconv_kernel(adj_ref, h_ref, w_ref, *rest,
                      node, in_ch, out_ch, n_edge, bblk, with_bias):
    # adj_ref: (B, n_edge, node, node)  adjacency block, native layout, bf16
    # h_ref:   (B, node, in)            node features, bf16
    # w_ref:   (in, n_edge*out)         fused per-edge weight slab (lane-dense RHS), bf16
    # b_ref:   (1, n_edge*out)          (only if with_bias) fused per-edge bias row, f32
    # o_ref:   (B, node, out)           output block, f32
    if with_bias:
        b_ref, o_ref = rest
    else:
        (o_ref,) = rest

    adj = adj_ref[...]

    # Stage 1: all per-edge linears as ONE MXU matmul with B*node rows.
    # node % 8 == 0, so the (B, node, in) -> (B*node, in) merge is layout-free.
    h2 = h_ref[...].reshape(bblk * node, in_ch)
    m_all = jnp.dot(h2, w_ref[...], preferred_element_type=jnp.float32)  # (B*node, E*out) f32
    if with_bias:
        m_all = m_all + b_ref[...]
    m_all = m_all.reshape(bblk, node, n_edge * out_ch)

    # Stage 2: hr = sum_e adj[:, e] @ m[:, :, e*out:(e+1)*out], unrolled over edges,
    # f32 accumulation. The lane slices feed the MXU directly (no concat / relayout).
    acc = jnp.zeros((bblk, node, out_ch), dtype=jnp.float32)
    for e in range(n_edge):
        m_e = m_all[:, :, e * out_ch:(e + 1) * out_ch].astype(adj.dtype)
        acc = acc + jnp.einsum("bnk,bko->bno", adj[:, e], m_e,
                               preferred_element_type=jnp.float32)

    # TODO(synk): out_ch=32 < 128 lanes => masked stores; at production sizes pack the
    # output lanes to a multiple of 128 (e.g. (node, B*out)) for unmasked vst.
    o_ref[...] = acc.astype(o_ref.dtype)


def spectral_norm_weight(weight, u, bound=True):
    """Exact forward-time SpectralNorm.compute_weight (one power-iteration step)."""
    weight_mat = weight.reshape(weight.shape[0], -1)
    v = weight_mat.T @ u
    v = v / jnp.linalg.norm(v)
    u_new = weight_mat @ v
    u_new = u_new / jnp.linalg.norm(u_new)
    sigma = u_new @ weight_mat @ v
    if bound:
        # torch.clamp(sigma, max=1)
        w_sn = weight / (sigma + 1e-6) * jnp.minimum(sigma, 1.0)
    else:
        w_sn = weight / sigma
    return w_sn, u_new


def _pick_batch_block(mb, node):
    """Batch-block factor: fill MXU rows (target ~128 = B*node) but keep >= 2 grid
    steps so v7x's two TensorCores both get work on the 'parallel' batch axis."""
    b = max(1, min(mb, 128 // max(node, 1)))
    while b > 1 and mb // b < 2:
        b -= 1
    while b > 1 and mb % b != 0:
        b -= 1
    return max(b, 1)


def graph_conv_forward(adj_matrix, h, weight_orig, u, bias,
                       out_channels, n_edge_type, bound=True,
                       apply_bias=False, batch_block=None):
    """adj_matrix: (mb, n_edge, node, node); h: (mb, node, in_ch) -> (mb, node, out_ch)."""
    mb, node, in_ch = h.shape
    assert adj_matrix.shape == (mb, n_edge_type, node, node)

    # --- glue (plain JAX, weight-sized tensors only): spectral norm + weight slab ---
    w_sn, _ = spectral_norm_weight(weight_orig, u, bound=bound)      # (out*n_edge, in)
    # Linear column o*n_edge + e is (channel o, edge e)  =>  w_cat[i, e*out + o] =
    # w_sn[o*n_edge + e, i]: a lane-dense (in, n_edge*out) RHS slab.
    w_cat = jnp.transpose(
        w_sn.reshape(out_channels, n_edge_type, in_ch), (2, 1, 0)
    ).reshape(in_ch, n_edge_type * out_channels)

    # bf16 inputs (halve HBM bytes on the dominant adj stream; MXU native bf16 rate);
    # both in-kernel dots accumulate in f32.
    # TODO(synk): 0/1 adjacency could go int8 (v5e/v6e) / fp8 (v7x) for another 2x.
    adj_bf = adj_matrix.astype(jnp.bfloat16)
    h_bf = h.astype(jnp.bfloat16)
    w_bf = w_cat.astype(jnp.bfloat16)

    bblk = batch_block if batch_block is not None else _pick_batch_block(mb, node)
    assert mb % bblk == 0, "batch block must divide the batch size"
    grid = (mb // bblk,)

    kernel = partial(_graphconv_kernel, node=node, in_ch=in_ch, out_ch=out_channels,
                     n_edge=n_edge_type, bblk=bblk, with_bias=apply_bias)

    in_specs = [
        pl.BlockSpec((bblk, n_edge_type, node, node), lambda b: (b, 0, 0, 0)),   # adj (native)
        pl.BlockSpec((bblk, node, in_ch), lambda b: (b, 0, 0)),                  # h
        pl.BlockSpec((in_ch, n_edge_type * out_channels), lambda b: (0, 0)),     # W slab
    ]
    args = [adj_bf, h_bf, w_bf]
    if apply_bias:
        # b_cat[0, e*out + o] = bias[o*n_edge + e]. Zero for this module
        # (spectral_norm zeroes the Linear bias), hence gated off by default.
        b_cat = jnp.transpose(bias.reshape(out_channels, n_edge_type), (1, 0)
                              ).reshape(1, n_edge_type * out_channels)
        in_specs.append(pl.BlockSpec((1, n_edge_type * out_channels), lambda b: (0, 0)))
        args.append(b_cat)

    out_dtype = h.dtype
    flops = 2 * mb * node * n_edge_type * out_channels * (in_ch + node)
    bytes_accessed = (adj_bf.size * adj_bf.dtype.itemsize
                      + h_bf.size * h_bf.dtype.itemsize
                      + w_bf.size * w_bf.dtype.itemsize
                      + mb * node * out_channels * jnp.dtype(out_dtype).itemsize)

    # TODO(synk): production-scale node counts need node/edge tiling of the adj block
    # (an "arbitrary" grid axis + f32 VMEM accumulator with pl.when init/finalize) so the
    # double-buffered adj block stays well under v7x's 64 MiB VMEM / v5e's scoped limit;
    # at these toy sizes every block fits everywhere.
    # TODO(synk): add_self=True branch (second spectral-norm Linear) not implemented;
    # module default is add_self=False.
    out = pl.pallas_call(
        kernel,
        out_shape=jax.ShapeDtypeStruct((mb, node, out_channels), out_dtype),
        grid_spec=pltpu.PrefetchScalarGridSpec(
            num_scalar_prefetch=0,
            grid=grid,
            in_specs=in_specs,
            out_specs=pl.BlockSpec((bblk, node, out_channels), lambda b: (b, 0, 0)),
        ),
        compiler_params=pltpu.CompilerParams(
            dimension_semantics=("parallel",),     # v7x: two TCs split the batch axis
            vmem_limit_bytes=48 * 1024 * 1024,     # explicit; headroom on v7x (64 MiB)
        ),
        cost_estimate=pl.CostEstimate(flops=flops, transcendentals=0,
                                      bytes_accessed=bytes_accessed),
    )(*args)
    return out


def graph_conv_reference(adj_matrix, h, weight_orig, u, bias,
                         out_channels, n_edge_type, bound=True):
    """Plain-JAX (f32) reference matching the PyTorch forward exactly."""
    mb, node, in_ch = h.shape
    w_sn, _ = spectral_norm_weight(weight_orig, u, bound=bound)
    m = h @ w_sn.T + bias                                   # (mb, node, out*n_edge)
    m = m.reshape(mb, node, out_channels, n_edge_type)
    m = jnp.transpose(m, (0, 3, 1, 2))                      # (mb, n_edge, node, out)
    hr = jnp.matmul(adj_matrix, m)                          # (mb, n_edge, node, out)
    return hr.sum(axis=1)                                   # (mb, node, out)


if __name__ == "__main__":
    # Small, deterministic problem sizes implied by the module.
    mb = 2
    node = 8
    in_channels = 16
    out_channels = 32
    n_edge_type = 4
    std = 1.0

    key = jax.random.PRNGKey(0)
    k_adj, k_h, k_w, k_u = jax.random.split(key, 4)

    adj = jax.random.uniform(k_adj, (mb, n_edge_type, node, node), jnp.float32)
    h = jax.random.normal(k_h, (mb, node, in_channels), jnp.float32)

    # Parameters: nn.Linear(in, out*n_edge) with normal_(0, std) init, zero bias,
    # plus the spectral-norm `u` buffer (standard normal).
    weight_orig = std * jax.random.normal(
        k_w, (out_channels * n_edge_type, in_channels), jnp.float32)
    bias = jnp.zeros((out_channels * n_edge_type,), jnp.float32)   # zeroed by spectral_norm
    u = jax.random.normal(k_u, (out_channels * n_edge_type,), jnp.float32)

    out = graph_conv_forward(adj, h, weight_orig, u, bias,
                             out_channels, n_edge_type, bound=True)
    out = jax.block_until_ready(out)

    ref = graph_conv_reference(adj, h, weight_orig, u, bias,
                               out_channels, n_edge_type, bound=True)
    assert out.shape == (mb, node, out_channels)
    # Kernel runs bf16 inputs with f32 accumulation (per perf review); tolerance is
    # set for ~0.5% relative error of that pipeline vs the f32 reference.
    assert jnp.allclose(out, ref, atol=3e-2, rtol=2e-2), "mismatch vs reference"

    print("KERNEL_OK")
</pallas_src>

<mosaic_0001>
module attributes {stable_mosaic.version = 11 : i64} {
  func.func @_graphconv_kernel(%arg0: i32, %arg1: memref<1x4x8x8xbf16, #tpu.memory_space<vmem>>, %arg2: memref<1x8x16xbf16, #tpu.memory_space<vmem>>, %arg3: memref<16x128xbf16, #tpu.memory_space<vmem>>, %arg4: memref<1x8x32xf32, #tpu.memory_space<vmem>>) attributes {dimension_semantics = [#tpu.dimension_semantics<parallel>], iteration_bounds = array<i64: 2>, scalar_prefetch = 0 : i64, scratch_operands = 0 : i64, tpu.core_type = #tpu.core_type<tc>, window_params = [{transform_indices = @transform_0, window_bounds = array<i64: 1, 4, 8, 8>}, {transform_indices = @transform_1, window_bounds = array<i64: 1, 8, 16>}, {pipeline_mode = #tpu.pipeline_mode<synchronous>, transform_indices = @transform_2, window_bounds = array<i64: 16, 128>}, {transform_indices = @transform_3, window_bounds = array<i64: 1, 8, 32>}]} {
    %c0 = arith.constant 0 : index
    %c0_0 = arith.constant 0 : index
    %c0_1 = arith.constant 0 : index
    %c0_2 = arith.constant 0 : index
    %0 = vector.load %arg1[%c0, %c0_0, %c0_1, %c0_2] : memref<1x4x8x8xbf16, #tpu.memory_space<vmem>>, vector<1x4x8x8xbf16>
    %c0_3 = arith.constant 0 : index
    %c0_4 = arith.constant 0 : index
    %c0_5 = arith.constant 0 : index
    %1 = vector.load %arg2[%c0_3, %c0_4, %c0_5] : memref<1x8x16xbf16, #tpu.memory_space<vmem>>, vector<1x8x16xbf16>
    %2 = vector.shape_cast %1 : vector<1x8x16xbf16> to vector<8x16xbf16>
    %c0_6 = arith.constant 0 : index
    %c0_7 = arith.constant 0 : index
    %3 = vector.load %arg3[%c0_6, %c0_7] : memref<16x128xbf16, #tpu.memory_space<vmem>>, vector<16x128xbf16>
    %cst = arith.constant dense<0.000000e+00> : vector<8x128xf32>
    %4 = tpu.matmul %2, %3, %cst {dimension_numbers = #tpu.dot_dimension_numbers<[1], [0], [0], [1], [0, 0, 1, 1], [], []>} : vector<8x16xbf16>, vector<16x128xbf16>, vector<8x128xf32> -> vector<8x128xf32>
    %5 = vector.shape_cast %4 : vector<8x128xf32> to vector<1x8x128xf32>
    %cst_8 = arith.constant 0.000000e+00 : f32
    %6 = vector.broadcast %cst_8 : f32 to vector<1x8x32xf32>
    %7 = vector.extract_strided_slice %5 {offsets = [0, 0, 0], sizes = [1, 8, 32], strides = [1, 1, 1]} : vector<1x8x128xf32> to vector<1x8x32xf32>
    %8 = arith.truncf %7 : vector<1x8x32xf32> to vector<1x8x32xbf16>
    %9 = vector.extract_strided_slice %0 {offsets = [0, 0, 0, 0], sizes = [1, 1, 8, 8], strides = [1, 1, 1, 1]} : vector<1x4x8x8xbf16> to vector<1x1x8x8xbf16>
    %10 = vector.shape_cast %9 : vector<1x1x8x8xbf16> to vector<1x8x8xbf16>
    "tpu.trace_start"() <{level = 10 : i32, message = "bnk,bko->bno"}> : () -> ()
    %cst_9 = arith.constant dense<0.000000e+00> : vector<1x8x32xf32>
    %11 = tpu.matmul %10, %8, %cst_9 {dimension_numbers = #tpu.dot_dimension_numbers<[2], [1], [1], [2], [0, 0, 0, 1, 1, 2], [0], [0]>} : vector<1x8x8xbf16>, vector<1x8x32xbf16>, vector<1x8x32xf32> -> vector<1x8x32xf32>
    "tpu.trace_stop"() : () -> ()
    %12 = arith.addf %6, %11 : vector<1x8x32xf32>
    %13 = vector.extract_strided_slice %5 {offsets = [0, 0, 32], sizes = [1, 8, 32], strides = [1, 1, 1]} : vector<1x8x128xf32> to vector<1x8x32xf32>
    %14 = arith.truncf %13 : vector<1x8x32xf32> to vector<1x8x32xbf16>
    %15 = vector.extract_strided_slice %0 {offsets = [0, 1, 0, 0], sizes = [1, 1, 8, 8], strides = [1, 1, 1, 1]} : vector<1x4x8x8xbf16> to vector<1x1x8x8xbf16>
    %16 = vector.shape_cast %15 : vector<1x1x8x8xbf16> to vector<1x8x8xbf16>
    "tpu.trace_start"() <{level = 10 : i32, message = "bnk,bko->bno"}> : () -> ()
    %cst_10 = arith.constant dense<0.000000e+00> : vector<1x8x32xf32>
    %17 = tpu.matmul %16, %14, %cst_10 {dimension_numbers = #tpu.dot_dimension_numbers<[2], [1], [1], [2], [0, 0, 0, 1, 1, 2], [0], [0]>} : vector<1x8x8xbf16>, vector<1x8x32xbf16>, vector<1x8x32xf32> -> vector<1x8x32xf32>
    "tpu.trace_stop"() : () -> ()
    %18 = arith.addf %12, %17 : vector<1x8x32xf32>
    %19 = vector.extract_strided_slice %5 {offsets = [0, 0, 64], sizes = [1, 8, 32], strides = [1, 1, 1]} : vector<1x8x128xf32> to vector<1x8x32xf32>
    %20 = arith.truncf %19 : vector<1x8x32xf32> to vector<1x8x32xbf16>
    %21 = vector.extract_strided_slice %0 {offsets = [0, 2, 0, 0], sizes = [1, 1, 8, 8], strides = [1, 1, 1, 1]} : vector<1x4x8x8xbf16> to vector<1x1x8x8xbf16>
    %22 = vector.shape_cast %21 : vector<1x1x8x8xbf16> to vector<1x8x8xbf16>
    "tpu.trace_start"() <{level = 10 : i32, message = "bnk,bko->bno"}> : () -> ()
    %cst_11 = arith.constant dense<0.000000e+00> : vector<1x8x32xf32>
    %23 = tpu.matmul %22, %20, %cst_11 {dimension_numbers = #tpu.dot_dimension_numbers<[2], [1], [1], [2], [0, 0, 0, 1, 1, 2], [0], [0]>} : vector<1x8x8xbf16>, vector<1x8x32xbf16>, vector<1x8x32xf32> -> vector<1x8x32xf32>
    "tpu.trace_stop"() : () -> ()
    %24 = arith.addf %18, %23 : vector<1x8x32xf32>
    %25 = vector.extract_strided_slice %5 {offsets = [0, 0, 96], sizes = [1, 8, 32], strides = [1, 1, 1]} : vector<1x8x128xf32> to vector<1x8x32xf32>
    %26 = arith.truncf %25 : vector<1x8x32xf32> to vector<1x8x32xbf16>
    %27 = vector.extract_strided_slice %0 {offsets = [0, 3, 0, 0], sizes = [1, 1, 8, 8], strides = [1, 1, 1, 1]} : vector<1x4x8x8xbf16> to vector<1x1x8x8xbf16>
    %28 = vector.shape_cast %27 : vector<1x1x8x8xbf16> to vector<1x8x8xbf16>
    "tpu.trace_start"() <{level = 10 : i32, message = "bnk,bko->bno"}> : () -> ()
    %cst_12 = arith.constant dense<0.000000e+00> : vector<1x8x32xf32>
    %29 = tpu.matmul %28, %26, %cst_12 {dimension_numbers = #tpu.dot_dimension_numbers<[2], [1], [1], [2], [0, 0, 0, 1, 1, 2], [0], [0]>} : vector<1x8x8xbf16>, vector<1x8x32xbf16>, vector<1x8x32xf32> -> vector<1x8x32xf32>
    "tpu.trace_stop"() : () -> ()
    %30 = arith.addf %24, %29 : vector<1x8x32xf32>
    %c0_13 = arith.constant 0 : index
    %c0_14 = arith.constant 0 : index
    %c0_15 = arith.constant 0 : index
    %31 = vector.load %arg4[%c0_13, %c0_14, %c0_15] : memref<1x8x32xf32, #tpu.memory_space<vmem>>, vector<1x8x32xf32>
    tpu.vector_store %arg4[%c0_13, %c0_14, %c0_15], %30 {strides = array<i32>} : memref<1x8x32xf32, #tpu.memory_space<vmem>>, vector<1x8x32xf32>,
    return
  }
  func.func @transform_0(%arg0: i32) -> (i32, i32, i32, i32) {
    %c0_i32 = arith.constant 0 : i32
    %c0_i32_0 = arith.constant 0 : i32
    %c0_i32_1 = arith.constant 0 : i32
    %c0_i32_2 = arith.constant 0 : i32
    return %arg0, %c0_i32, %c0_i32_0, %c0_i32_1 : i32, i32, i32, i32
  }
  func.func @transform_1(%arg0: i32) -> (i32, i32, i32) {
    %c0_i32 = arith.constant 0 : i32
    %c0_i32_0 = arith.constant 0 : i32
    %c0_i32_1 = arith.constant 0 : i32
    return %arg0, %c0_i32, %c0_i32_0 : i32, i32, i32
  }
  func.func @transform_2(%arg0: i32) -> (i32, i32) {
    %c0_i32 = arith.constant 0 : i32
    %c0_i32_0 = arith.constant 0 : i32
    %c0_i32_1 = arith.constant 0 : i32
    return %c0_i32, %c0_i32_0 : i32, i32
  }
  func.func @transform_3(%arg0: i32) -> (i32, i32, i32) {
    %c0_i32 = arith.constant 0 : i32
    %c0_i32_0 = arith.constant 0 : i32
    %c0_i32_1 = arith.constant 0 : i32
    return %arg0, %c0_i32, %c0_i32_0 : i32, i32, i32
  }
}

</mosaic_0001>

<bundles_post_ra>
// kernel: tpu_custom_call.1
= control target key start
LH: loop header
LB: loop body
LE: loop exit
PB: predicated region body
PF: predicated region fallthrough
CT: control target
= control target key end

     0   :  { %s1214_s0 = inlined_call_operand.hbm [shape: bf16[2,4,8,8], index: 0, kind: input, shape index: {}]   ;;  %s1215_s1 = inlined_call_operand.hbm [shape: bf16[2,8,16], index: 1, kind: input, shape index: {}]   ;;  %s1216_s2 = inlined_call_operand.hbm [shape: bf16[16,128], index: 2, kind: input, shape index: {}]   ;;  %s1217_s3 = inlined_call_operand.hbm [shape: f32[2,8,32], index: 3, kind: output, shape index: {}]  }
   0x1   :  { %1222 = sst [smem:[#allocation13_spill]] %s1214_s0 }
   0x2   :  { %8 = vsyncpa [#allocation3], 0 }
   0x3   :  { %10 = vsyncpa [#allocation3 + $0x1], 0 }
   0x4   :  { %11 = vsyncpa [#allocation6], 0 }
   0x5   :  { %13 = vsyncpa [#allocation6 + $0x1], 0 }
   0x6   :  { %14 = vsyncpa [#allocation4], 0 }
   0x7   :  { %16 = vsyncpa [#allocation4 + $0x1], 0  ;;  %s951_s12 = smov 0   ;;  %s953_s13 = smov 0  }
   0x8   :  { %s955_s14 = smov 0   ;;  %s957_s15 = smov 0  }
   0x9 LB: > { %s972_s16 = sadd.s32 4294967295, %s918_s15   ;;  %s612_s17 = sadd.s32 4294967294, %s918_s15   ;;  %s918_s15 = sphi %s957_s15, %s1241_s15   ;;  %s914_s14 = sphi %s955_s14, %s1240_s14   ;;  %s910_s13 = sphi %s953_s13, %s1239_s13   ;;  %s906_s12 = sphi %s951_s12, %s1238_s12  }
   0xa   : > { %p42_p0 = scmp.ne.s32.totalorder %s910_s13, %s906_s12  ;;  %p1218_p1 = scmp.eq.s32.totalorder %s972_s16, 0 }
   0xb   : > { %p119_p3 = scmp.eq.s32.totalorder %s612_s17, 1  ;;  %p613_p5 = scmp.ge.s32.totalorder %s918_s15, 1 }
   0xc   : > { %p981_p4 = por %p1218_p1, %p42_p0  ;;  %p126_p7 = scmp.lt.s32.totalorder %s918_s15, 3 }
   0xd   : > { %p986_p6 = por %p119_p3, %p42_p0  ;;  %s920_s21 = smov [#allocation7]  }
   0xe   : > { %s1223_s18 = scalar_select %p981_p4, 1, 0 }
   0xf   : > { %s1224_s19 = scalar_select %p986_p6, 1, 0 }
  0x10   : > { %p991_p8 = pnand %p613_p5, %p126_p7  ;;  %s138_s22 = sshll.u32 %s920_s21, 4  ;;  %s995_s22 = int_to_ptr.vmem [resolvable:$true] %s138_s22 }
  0x11   : > { %s1007_s24 = sadd.s32 1, %s918_s15   ;;  %s29_s25 = sadd.s32 1, %s914_s14 }
  0x12   : > { %s1225_s20 = scalar_select %p991_p8, 1, 0 }
  0x13   : > { %p696_p9 = pneg %p991_p8  ;;  %s26_s26 = ssub.s32 %s918_s15, %s1007_s24 }
  0x14   : > { %s756_s29 = scalar_lea.hbm %s1216_s2, 128 }
  0x15   : > { %p1002_p11 = pnand %p696_p9, %p1218_p1  ;;  %p757_p12 = scmp.ne.s32.totalorder %s1216_s2, %s756_s29 }
  0x16   : > { %p763_p5 = scmp.lt.u32.totalorder %s756_s29, %s1216_s2 }
  0x17   : > { %p758_p13 = pneg %p1002_p11 }
  0x19   : > { %p759_p0 = pnand %p758_p13, %p757_p12 }
  0x1b   : > { %p760_p3 = pneg %p759_p0 }
  0x1d   : > { %p765_p7 = pnand %p763_p5, %p760_p3 }
  0x1f   : > { %768 = shalt.err (!%p765_p7)
}
  0x20   : > { %s769_s7 = scalar_lea.vmem %s995_s22, 128  ;;  %p777_p2 = scmp.lt.s32.totalorder %s995_s22, %s995_s22 }
  0x21   : > { %p770_p9 = scmp.ne.s32.totalorder %s995_s22, %s769_s7  ;;  %p778_p6 = scmp.lt.s32.totalorder %s769_s7, %s769_s7 }
  0x23   : > { %p772_p10 = pnand %p770_p9, %p758_p13  ;;  %p779_p4 = por %p778_p6, %p777_p2 }
  0x25   : > { %p773_p1 = pneg %p772_p10 }
  0x27   : > { %p780_p8 = pnand %p779_p4, %p773_p1 }
  0x29   : > { %783 = shalt.err (!%p780_p8)
}
  0x2a   : > { %s921_s8 = smov 64   ;;  %s922_s9 = smov 4  }
  0x2b   : > { %699 = dma.hbm_to_vmem [thread:$0]  (!%p1002_p11), %s1216_s2, 128, %s995_s22, [#allocation6], %s921_s8, %s921_s8, %s922_s9  }
  0x2c   : > { %p27_p1 = scmp.eq.s32.totalorder %s26_s26, 0  ;;  %p36_p2 = scmp.ne.s32.totalorder %s914_s14, %s910_s13 }
  0x2d   : > { %p37_p4 = scmp.eq.s32.totalorder %s918_s15, 0  ;;  %p712_p6 = scmp.lt.s32.totalorder %s918_s15, 2 }
  0x2e   : > { %s1041_s17 = scalar_select %p27_p1, %s914_s14, %s29_s25  }
  0x2f   : > { %p38_p8 = por %p37_p4, %p36_p2  ;;  %p1227_p10 = scmp.eq.s32.totalorder %s972_s16, 1 }
  0x30   : > { %s1050_s23 = sand.u32 1, %s914_s14   ;;  %s636_s27 = sshll.u32 %s918_s15, 8 }
  0x31   : > { %p1045_p12 = por %p1227_p10, %p36_p2  ;;  %s616_s28 = sshll.u32 %s1050_s23, 4 }
  0x32   : > { %s1229_s0 = sld [smem:[#allocation13_spill]]  ;;  %s156_s25 = scalar_lea.vmem [#allocation2], %s616_s28 }
  0x33   : > { %s1228_s21 = scalar_select %p1045_p12, 1, 0 }
  0x34   : > { %s163_s30 = sshll.u32 %s156_s25, 4  ;;  %p1059_p11 = pnand %p712_p6, %p38_p8  ;;  %s1063_s30 = int_to_ptr.vmem [resolvable:$true] %s163_s30 }
  0x35   : > { %s173_s5 = sand.u32 1, %s918_s15   ;;  %s153_s6 = scalar_lea.sflag [#allocation3], %s1050_s23 }
  0x36   : > { %p786_p0 = pneg %p1059_p11 }
  0x38   : > { %s1057_s26 = scalar_lea.hbm %s1229_s0, %s636_s27  ;;  %s789_s27 = scalar_lea.hbm %s1229_s0, 512 }
  0x39   : > { %s784_s7 = scalar_lea.hbm %s1057_s26, 256  ;;  %p790_p7 = scmp.lt.u32.totalorder %s1057_s26, %s1229_s0 }
  0x3a   : > { %p785_p13 = scmp.ne.s32.totalorder %s1057_s26, %s784_s7  ;;  %p791_p9 = scmp.lt.u32.totalorder %s789_s27, %s784_s7 }
  0x3b   : > { %p793_p2 = scmp.lt.u32.totalorder %s784_s7, %s1057_s26 }
  0x3c   : > { %p787_p3 = pnand %p786_p0, %p785_p13  ;;  %p792_p1 = por %p791_p9, %p790_p7 }
  0x3e   : > { %p788_p5 = pneg %p787_p3  ;;  %p794_p4 = por %p793_p2, %p792_p1 }
  0x40   : > { %p795_p6 = pnand %p794_p4, %p788_p5 }
  0x42   : > { %798 = shalt.err (!%p795_p6)
}
  0x43   : > { %s799_s29 = scalar_lea.vmem %s1063_s30, 256  ;;  %s923_s25 = smov [#allocation2]  }
  0x44   : > { %p800_p8 = scmp.ne.s32.totalorder %s1063_s30, %s799_s29  ;;  %s804_s10 = sshll.u32 %s923_s25, 4  ;;  %s805_s10 = int_to_ptr.vmem [resolvable:$false] %s804_s10 }
  0x45   : > { %s806_s11 = scalar_lea.vmem %s805_s10, 512  ;;  %p807_p3 = scmp.lt.s32.totalorder %s1063_s30, %s805_s10 }
  0x46   : > { %p802_p10 = pnand %p800_p8, %p786_p0  ;;  %p808_p7 = scmp.lt.s32.totalorder %s806_s11, %s799_s29 }
  0x48   : > { %p803_p13 = pneg %p802_p10  ;;  %p809_p9 = por %p808_p7, %p807_p3 }
  0x4a   : > { %p810_p1 = pnand %p809_p9, %p803_p13 }
  0x4c   : > { %813 = shalt.err (!%p810_p1)
}
  0x4d   : > { %703 = dma.hbm_to_vmem [thread:$0]  (!%p1059_p11), %s1057_s26, 256, %s1063_s30, %s153_s6, %s921_s8, %s921_s8, %s922_s9  }
  0x4e   : > { %s619_s7 = sshll.u32 %s1050_s23, 2  ;;  %s620_s27 = sshll.u32 %s918_s15, 6 }
  0x4f   : > { %s1102_s29 = scalar_lea.hbm %s1215_s1, %s620_s27  ;;  %s177_s25 = scalar_lea.vmem [#allocation5], %s619_s7 }
  0x50   : > { %s184_s10 = sshll.u32 %s177_s25, 4  ;;  %s174_s11 = scalar_lea.sflag [#allocation6], %s173_s5  ;;  %s185_s10 = int_to_ptr.vmem [resolvable:$true] %s184_s10 }
  0x51   : > { %s814_s0 = scalar_lea.hbm %s1102_s29, 64  ;;  %s819_s23 = scalar_lea.hbm %s1215_s1, 128 }
  0x52   : > { %p815_p5 = scmp.ne.s32.totalorder %s1102_s29, %s814_s0  ;;  %p820_p6 = scmp.lt.u32.totalorder %s1102_s29, %s1215_s1 }
  0x53   : > { %p821_p8 = scmp.lt.u32.totalorder %s819_s23, %s814_s0  ;;  %p823_p13 = scmp.lt.u32.totalorder %s814_s0, %s1102_s29 }
  0x54   : > { %p817_p2 = pnand %p815_p5, %p786_p0 }
  0x55   : > { %p822_p10 = por %p821_p8, %p820_p6 }
  0x56   : > { %p818_p4 = pneg %p817_p2 }
  0x57   : > { %p824_p3 = por %p823_p13, %p822_p10 }
  0x59   : > { %p825_p7 = pnand %p824_p3, %p818_p4 }
  0x5b   : > { %828 = shalt.err (!%p825_p7)
}
  0x5c   : > { %s829_s5 = scalar_lea.vmem %s185_s10, 64  ;;  %s924_s6 = smov [#allocation5]  }
  0x5d   : > { %p830_p9 = scmp.ne.s32.totalorder %s185_s10, %s829_s5  ;;  %s834_s7 = sshll.u32 %s924_s6, 4  ;;  %s835_s7 = int_to_ptr.vmem [resolvable:$false] %s834_s7 }
  0x5e   : > { %s836_s27 = scalar_lea.vmem %s835_s7, 128  ;;  %p837_p2 = scmp.lt.s32.totalorder %s185_s10, %s835_s7 }
  0x5f   : > { %p832_p1 = pnand %p830_p9, %p786_p0  ;;  %p838_p12 = scmp.lt.s32.totalorder %s836_s27, %s829_s5 }
  0x61   : > { %p833_p5 = pneg %p832_p1  ;;  %p839_p6 = por %p838_p12, %p837_p2 }
  0x63   : > { %p840_p8 = pnand %p839_p6, %p833_p5 }
  0x65   : > { %843 = shalt.err (!%p840_p8)
}
  0x66   : > { %706 = dma.hbm_to_vmem [thread:$0]  (!%p1059_p11), %s1102_s29, 64, %s185_s10, %s174_s11  }
  0x67   : > { %p1231_p4 = scmp.ne.s32.totalorder %s1225_s20, 0 }
  0x68   : > { %s1128_s0 = sand.u32 (!%p1231_p4), 1, %s910_s13   ;;  %p1232_p12 = scmp.ne.s32.totalorder (!%p1231_p4), %s1223_s18, 0 }
  0x69   : > { %193 = sbr.rel (%p1231_p4) target bundleno = 698 (0x2ba), region = 32  ;;  %s622_s28 = sshll.u32 (!%p1231_p4), %s1128_s0, 4 }
  0x6a   : > { %s196_s22 = scalar_lea.sflag (!%p1231_p4), [#allocation3], %s1128_s0  ;;  %s1132_s25 = scalar_lea.vmem (!%p1231_p4), [#allocation2], %s622_s28 }
  0x70   : > { %889 = dma.done.wait (%p1232_p12), %s196_s22, 256  }
  0x71   : > { %891 = vsyncadd (%p1232_p12), %s196_s22, 4294967040  ;;  %s204_s20 = sand.u32 1, %s972_s16   ;;  %s623_s4 = sshll.u32 %s1128_s0, 2 }
  0x72   : > { %s205_s29 = scalar_lea.sflag [#allocation6], %s204_s20  ;;  %s208_s10 = scalar_lea.vmem [#allocation5], %s623_s4 }
  0x73   : > { %893 = dma.done.wait (%p1232_p12), %s205_s29, 64  }
  0x74   : > { %895 = vsyncadd (%p1232_p12), %s205_s29, 4294967232  ;;  %p1233_p11 = scmp.eq.s32.totalorder %s972_s16, 0 }
  0x76   : > { %897 = dma.done.wait (%p1233_p11), [#allocation6], 128   ;;  %p1234_p0 = pmov %p1233_p11 }
  0x77   : > { %v925_v0 = vmov 0.0   ;;  %vm926_vm0 = vmmov 0   ;;  %v755_v1 = vld [vmem:[#allocation7] sm:$0xff]   ;;  %v245_v2 = vld [vmem:[%s208_s10] sm:$0xf]  ;;  %vm254_vm1 = vcmask 130048  }
  0x78   : > { %899 = vsyncadd (%p1234_p0), [#allocation6], 4294967168  ;;  %647 = vmatprep.subr.bf16.mxu0 %v925_v0  ;;  %649 = vmatprep.mubr.msk.bf16.mxu0 %vm926_vm0, %v925_v0  ;;  %vm306_vm2 = vcmask 1043456   ;;  %s927_s18 = smov 32   ;;  %s928_s11 = smov 64   ;;  %vm302_vm3 = vcmask 64512  }
  0x79   : > { %659 = vmatprep.subr.bf16.mxu1 %v925_v0  ;;  %661 = vmatprep.mubr.msk.bf16.mxu1 %vm926_vm0, %v925_v0  ;;  %v241_v9 = vld [vmem:[%s1132_s25] sm:$0xf]  ;;  %s929_s8 = smov 96   ;;  %v243_v13 = vld [vmem:[%s1132_s25 + $0x8] sm:$0xf]  ;;  %s625_s9 = sshll.u32 %s1128_s0, 3 }
  0x7a   : > { %648 = vmatpush3.bf16.msra.mxu0 %v755_v1  ;;  %v242_v17 = vld [vmem:[%s1132_s25 + $0x4] sm:$0xf]  ;;  %v244_v18 = vld [vmem:[%s1132_s25 + $0xc] sm:$0xf]  ;;  %s633_s23 = sshll.u32 %s972_s16, 7  ;;  %s239_s26 = scalar_lea.vmem [#allocation8], %s625_s9 }
  0x7b   : > { %653 = vmatprep.subr.bf16.mxu0 %v925_v0  ;;  %s510_s30 = sshll.u32 %s239_s26, 4  ;;  %vm494_vm4 = vcmask 261120   ;;  %s1170_s7 = scalar_lea.hbm %s1217_s3, %s633_s23  ;;  %s1172_s30 = int_to_ptr.vmem [resolvable:$true] %s510_s30 }
  0x7c   : > { %s497_s16 = scalar_lea.sflag [#allocation4], %s1128_s0  ;;  %s844_s27 = scalar_lea.vmem %s1172_s30, 128 }
  0x7d   : > { %650 = vmatmul.mubr.msk.bf16.vlgmr.msra.gmra.mrb[0].mxu0 %vm254_vm1, %v245_v2  ;;  %p845_p10 = scmp.ne.s32.totalorder %s1172_s30, %s844_s27  ;;  %p1235_p13 = scmp.ne.s32.totalorder %s1228_s21, 0 }
  0x7e   : > { %655 = vmatprep.mubr.msk.bf16.mxu0 %vm926_vm0, %v925_v0  ;;  %s930_s28 = smov [#allocation8]  }
  0x7f   : > { %p846_p3 = pnand %p845_p10, %p1235_p13  ;;  %s848_s22 = sshll.u32 %s930_s28, 4  ;;  %s849_s22 = int_to_ptr.vmem [resolvable:$false] %s848_s22 }
  0x80   : > { %s850_s25 = scalar_lea.vmem %s849_s22, 256  ;;  %p851_p9 = scmp.lt.s32.totalorder %s1172_s30, %s849_s22 }
  0x81   : > { %p847_p7 = pneg %p846_p3  ;;  %p852_p1 = scmp.lt.s32.totalorder %s850_s25, %s844_s27 }
  0x83   : > { %p853_p5 = por %p852_p1, %p851_p9 }
  0x85   : > { %p854_p2 = pnand %p853_p5, %p847_p7 }
 0x150   : > { %v292_v3 = vpop.f32.mrb[0].mxu0 }
 0x151   : > { %v298_v4 = vpack.c.bf16 %v292_v3, %v292_v3  ;;  %v651_v5 = vpop.f32.mrb[1].mxu0 }
 0x152   : > { %v295_v6 = vpop.f32.mrb[2].mxu0 }
 0x153   : > { %445 = vrot.lane.b32.xlu1 %v298_v4, %s927_s18  ;;  %396 = vrot.lane.b32.xlu0 %v298_v4, %s928_s11  ;;  %v652_v7 = vpop.f32.mrb[3].mxu0  ;;  %v354_v8 = vsel %vm306_vm2, %v298_v4, 0 }
 0x154   : > { %660 = vmatpush3.bf16.msra.mxu1 %v354_v8 }
 0x155   : > { %665 = vmatprep.subr.bf16.mxu1 %v925_v0 }
 0x157   : > { %300 = vrot.lane.b32.xlu0 %v298_v4, %s929_s8  ;;  %662 = vmatmul.mubr.msk.bf16.vlgmr.msra.gmra.mrb[0].mxu1 %vm302_vm3, %v241_v9 }
 0x158   : > { %667 = vmatprep.mubr.msk.bf16.mxu1 %vm926_vm0, %v925_v0 }
 0x1c5   : > { %v397_v10 = vpop.permute.xlu0 %396  ;;  %v446_v12 = vpop.permute.xlu1 %445 }
 0x1c6   : > { %v402_v11 = vsel %vm306_vm2, %v397_v10, 0  ;;  %v451_v15 = vsel %vm306_vm2, %v446_v12, 0 }
 0x1c7   : > { %666 = vmatpush3.bf16.msra.mxu1 %v402_v11 }
 0x1c8   : > { %671 = vmatprep.subr.bf16.mxu1 %v925_v0 }
 0x1c9   : > { %v301_v14 = vpop.permute.xlu0 %300 }
 0x1ca   : > { %v308_v16 = vsel %vm306_vm2, %v301_v14, 0  ;;  %668 = vmatmul.mubr.msk.bf16.vlgmr.msra.gmra.mrb[0].mxu1 %vm302_vm3, %v243_v13 }
 0x1cb   : > { %654 = vmatpush3.bf16.msra.mxu0 %v308_v16  ;;  %672 = vmatpush3.bf16.msra.mxu1 %v451_v15 }
 0x1cc   : > { %673 = vmatprep.mubr.msk.bf16.mxu1 %vm926_vm0, %v925_v0 }
 0x1ce   : > { %656 = vmatmul.mubr.msk.bf16.vlgmr.msra.gmra.mrb[4].mxu0 %vm302_vm3, %v242_v17 }
 0x1d6   : > { %674 = vmatmul.mubr.msk.bf16.vlgmr.msra.gmra.mrb[0].mxu1 %vm302_vm3, %v244_v18 }
 0x2a1   : > { %v344_v19 = vpop.f32.mrb[4].mxu0 }
 0x2a2   : > { %v657_v20 = vpop.f32.mrb[5].mxu0 }
 0x2a3   : > { %v347_v21 = vpop.f32.mrb[6].mxu0 }
 0x2a4   : > { %v658_v22 = vpop.f32.mrb[7].mxu0 }
 0x2a9   : > { %v487_v23 = vpop.f32.mrb[0].mxu1 }
 0x2aa   : > { %v677_v24 = vadd.f32 %v487_v23, %v344_v19  ;;  %v675_v25 = vpop.f32.mrb[1].mxu1 }
 0x2ab   : > { %v490_v26 = vpop.f32.mrb[2].mxu1 }
 0x2ac   : > { %v676_v27 = vpop.f32.mrb[3].mxu1  ;;  %495 = vst.msk [vmem:[%s239_s26] sm:$0xff] %vm494_vm4, %v677_v24 }
 0x2ad   : > { %857 = shalt.err (!%p854_p2)
}
 0x2ae   : > { %s858_s0 = scalar_lea.hbm %s1170_s7, 128  ;;  %s862_s29 = scalar_lea.hbm %s1217_s3, 256 }
 0x2af   : > { %p859_p6 = scmp.ne.s32.totalorder %s1170_s7, %s858_s0  ;;  %p863_p12 = scmp.lt.u32.totalorder %s1170_s7, %s1217_s3 }
 0x2b0   : > { %p864_p11 = scmp.lt.u32.totalorder %s862_s29, %s858_s0  ;;  %p866_p10 = scmp.lt.u32.totalorder %s858_s0, %s1170_s7 }
 0x2b1   : > { %p860_p8 = pnand %p859_p6, %p1235_p13 }
 0x2b2   : > { %p865_p0 = por %p864_p11, %p863_p12 }
 0x2b3   : > { %p861_p4 = pneg %p860_p8 }
 0x2b4   : > { %p867_p3 = por %p866_p10, %p865_p0 }
 0x2b6   : > { %p868_p7 = pnand %p867_p3, %p861_p4 }
 0x2b8   : > { %871 = shalt.err (!%p868_p7)
}
 0x2b9   : > { %694 = dma.vmem_to_hbm [thread:$0]  (%p1235_p13), %s1172_s30, 128, %s1170_s7, %s497_s16  }
 0x2ba PF: > { %s522_s11 = sand.u32 1, %s906_s12   ;;  %p1236_p9 = scmp.ne.s32.totalorder %s1224_s19, 0 }
 0x2bb   : > { %p1237_p1 = scmp.ge.s32.totalorder %s918_s15, 2  ;;  %s523_s8 = scalar_lea.sflag [#allocation4], %s522_s11 }
 0x2bd   : > { %p708_p5 = pnand %p1237_p1, %p1236_p9 }
 0x2bf   : > { %901 = dma.done.wait (!%p708_p5), %s523_s8, 128  }
 0x2c0   : > { %903 = vsyncadd (!%p708_p5), %s523_s8, 4294967168  ;;  %p19_p2 = scmp.ge.s32.totalorder %s1007_s24, 4   ;;  %s1238_s12 = smov %s910_s13 }
 0x2c1   : > { %s1239_s13 = smov %s914_s14  ;;  %s1240_s14 = smov %s1041_s17 }
 0x2c2   : > { %s1241_s15 = smov %s1007_s24  ;;  %21 = sbr.rel (!%p19_p2) target bundleno = 9 (0x9), region = 94 }
 0x2c9   :  { %528 = vsyncpa [#allocation3], 1 }
 0x2ca   :  { %530 = vsyncpa [#allocation3 + $0x1], 1 }
 0x2cb   :  { %531 = vsyncpa [#allocation6], 1 }
 0x2cc   :  { %533 = vsyncpa [#allocation6 + $0x1], 1 }
 0x2cd   :  { %534 = vsyncpa [#allocation4], 1 }
 0x2ce   :  { %536 = vsyncpa [#allocation4 + $0x1], 1 }

</bundles_post_ra>
